<compile_context>
chip_gen: v6e
topology: v6e:2x2x1
jax: 0.10.0
libtpu: 0.0.40
codegen_flags: <defaults>
</compile_context>

<pallas_src>
import functools

import jax
import jax.numpy as jnp
from jax import lax
from jax.experimental import pallas as pl
from jax.experimental.pallas import tpu as pltpu


_VMEM_LIMIT_BYTES = 48 * 1024 * 1024  # well above the per-step working set,
                                      # below v7x's 64 MiB physical VMEM.


def _pick_tile(n, cap):
    """Largest MXU/VPU-friendly tile <= cap that evenly divides n."""
    for t in (1024, 512, 256, 128, 64, 32, 16, 8):
        if t <= cap and t <= n and n % t == 0:
            return t
    return n  # block == full dim is always a legal BlockSpec


# ---------------------------------------------------------------------------
# Kernel 1: GroupNorm statistics -> folded per-channel (scale, shift).
# ---------------------------------------------------------------------------
def _gn_stats_kernel(x_ref, gamma_ref, beta_ref, gmap_ref, gmapT_ref,
                     scale_ref, shift_ref, *, eps, inv_count):
    s_idx = pl.program_id(1)

    @pl.when(s_idx == 0)
    def _():
        scale_ref[...] = jnp.zeros_like(scale_ref)
        shift_ref[...] = jnp.zeros_like(shift_ref)

    x = x_ref[0].astype(jnp.float32)                       # (tn, C)
    # Use the resident output blocks as accumulators (sum / sum of squares).
    scale_ref[0] += jnp.sum(x, axis=0, keepdims=True)      # (1, C)
    shift_ref[0] += jnp.sum(x * x, axis=0, keepdims=True)  # (1, C)

    @pl.when(s_idx == pl.num_programs(1) - 1)
    def _():
        sum_c = scale_ref[0]                               # (1, C)
        sumsq_c = shift_ref[0]                             # (1, C)
        gmap = gmap_ref[...]                               # (C, G) one-hot
        gmapT = gmapT_ref[...]                             # (G, C) one-hot
        mean_g = jnp.dot(sum_c, gmap, preferred_element_type=jnp.float32) * inv_count
        msq_g = jnp.dot(sumsq_c, gmap, preferred_element_type=jnp.float32) * inv_count
        var_g = msq_g - mean_g * mean_g
        rstd_g = lax.rsqrt(var_g + eps)
        mean_c = jnp.dot(mean_g, gmapT, preferred_element_type=jnp.float32)   # (1, C)
        rstd_c = jnp.dot(rstd_g, gmapT, preferred_element_type=jnp.float32)   # (1, C)
        sc = rstd_c * gamma_ref[...]
        scale_ref[0] = sc
        shift_ref[0] = beta_ref[...] - mean_c * sc


# ---------------------------------------------------------------------------
# Kernel 2: apply folded GroupNorm, then q/k/v 1x1-conv projections (bf16 MXU).
# ---------------------------------------------------------------------------
def _norm_qkv_kernel(x_ref, scale_ref, shift_ref,
                     wq_ref, bq_ref, wk_ref, bk_ref, wv_ref, bv_ref,
                     q_ref, k_ref, v_ref):
    x = x_ref[0].astype(jnp.float32)                       # (tn, C)
    h = x * scale_ref[0] + shift_ref[0]                    # folded GroupNorm (f32)
    hb = h.astype(jnp.bfloat16)                            # bf16 MXU operands
    q = jnp.dot(hb, wq_ref[...], preferred_element_type=jnp.float32) + bq_ref[...]
    k = jnp.dot(hb, wk_ref[...], preferred_element_type=jnp.float32) + bk_ref[...]
    v = jnp.dot(hb, wv_ref[...], preferred_element_type=jnp.float32) + bv_ref[...]
    q_ref[0] = q.astype(q_ref.dtype)
    k_ref[0] = k.astype(k_ref.dtype)
    v_ref[0] = v.astype(v_ref.dtype)


# ---------------------------------------------------------------------------
# Kernel 3: flash attention (online softmax) + proj_out + residual.
# ---------------------------------------------------------------------------
def _flash_attn_kernel(q_ref, k_ref, v_ref, x_ref, wp_ref, bp_ref,
                       o_ref, m_ref, l_ref, acc_ref):
    j = pl.program_id(2)

    @pl.when(j == 0)
    def _():
        m_ref[...] = jnp.full_like(m_ref, -jnp.inf)
        l_ref[...] = jnp.zeros_like(l_ref)
        acc_ref[...] = jnp.zeros_like(acc_ref)

    q = q_ref[0]                                           # (tq, C)  bf16 (pre-scaled)
    k = k_ref[0]                                           # (tkv, C) bf16
    # NT matmul: contract last dims of both operands -> no k-tile transpose.
    s = lax.dot_general(q, k, (((1,), (1,)), ((), ())),
                        preferred_element_type=jnp.float32)  # (tq, tkv) f32

    m_prev = m_ref[...]
    m_new = jnp.maximum(m_prev, jnp.max(s, axis=-1, keepdims=True))
    alpha = jnp.exp(m_prev - m_new)
    p = jnp.exp(s - m_new)                                 # (tq, tkv) f32
    l_ref[...] = alpha * l_ref[...] + jnp.sum(p, axis=-1, keepdims=True)
    acc_ref[...] = alpha * acc_ref[...] + jnp.dot(
        p.astype(jnp.bfloat16), v_ref[0], preferred_element_type=jnp.float32)
    m_ref[...] = m_new

    @pl.when(j == pl.num_programs(2) - 1)
    def _():
        # Normalize AFTER the P@V matmul (HW*C work, not HW^2); EUP reciprocal.
        out = acc_ref[...] * pl.reciprocal(l_ref[...], approx=True)   # (tq, C)
        proj = jnp.dot(out.astype(jnp.bfloat16), wp_ref[...],
                       preferred_element_type=jnp.float32) + bp_ref[...]
        o_ref[0] = (x_ref[0].astype(jnp.float32) + proj).astype(o_ref.dtype)


# ---------------------------------------------------------------------------
# Wrapper
# ---------------------------------------------------------------------------
def attn_block_2d(x_nchw, params, *, num_groups=32, eps=1e-6,
                  q_tile=256, kv_tile=256, norm_tile=512):
    """x_nchw: (B, C, H, W) float32. params: dict of weights (see main)."""
    B, C, H, W = x_nchw.shape
    HW = H * W
    assert C % num_groups == 0
    cpg = C // num_groups
    attn_scale = float(int(C) ** (-0.5))

    # NCHW -> (B, HW, C): channel dim last (lane-dense for C >= 128).
    x = jnp.transpose(x_nchw, (0, 2, 3, 1)).reshape(B, HW, C)

    tn = _pick_tile(HW, norm_tile)
    tq = _pick_tile(HW, q_tile)
    tkv = _pick_tile(HW, kv_tile)

    # channel<->group one-hot maps, precomputed (both orientations) in wrapper.
    gmap = (jnp.arange(C)[:, None] // cpg ==
            jnp.arange(num_groups)[None, :]).astype(jnp.float32)   # (C, G)
    gmapT = gmap.T                                                 # (G, C)

    gamma = params["gamma"].reshape(1, C).astype(jnp.float32)
    beta = params["beta"].reshape(1, C).astype(jnp.float32)

    # 1x1-conv weights transposed to (Cin, Cout); softmax 1/sqrt(C) folded into q.
    wq = (params["wq"].T * attn_scale).astype(jnp.bfloat16)
    wk = params["wk"].T.astype(jnp.bfloat16)
    wv = params["wv"].T.astype(jnp.bfloat16)
    wp = params["wp"].T.astype(jnp.bfloat16)
    bq = (params["bq"] * attn_scale).reshape(1, C).astype(jnp.float32)
    bk = params["bk"].reshape(1, C).astype(jnp.float32)
    bv = params["bv"].reshape(1, C).astype(jnp.float32)
    bp = params["bp"].reshape(1, C).astype(jnp.float32)

    vec_spec2 = pl.BlockSpec((1, C), lambda b, s: (0, 0))
    mat_spec2 = pl.BlockSpec((C, C), lambda b, s: (0, 0))
    stat_spec2 = pl.BlockSpec((1, 1, C), lambda b, s: (b, 0, 0))
    row_spec2 = pl.BlockSpec((1, tn, C), lambda b, s: (b, s, 0))

    # ---- Stage 1: GroupNorm stats -> folded per-channel scale / shift -------
    gn_scale, gn_shift = pl.pallas_call(
        functools.partial(_gn_stats_kernel, eps=eps,
                          inv_count=1.0 / float(HW * cpg)),
        out_shape=(jax.ShapeDtypeStruct((B, 1, C), jnp.float32),
                   jax.ShapeDtypeStruct((B, 1, C), jnp.float32)),
        grid=(B, HW // tn),
        in_specs=[
            row_spec2,                                          # x
            vec_spec2, vec_spec2,                               # gamma, beta
            pl.BlockSpec((C, num_groups), lambda b, s: (0, 0)),  # gmap
            pl.BlockSpec((num_groups, C), lambda b, s: (0, 0)),  # gmap.T
        ],
        out_specs=(stat_spec2, stat_spec2),
        compiler_params=pltpu.CompilerParams(
            dimension_semantics=("parallel", "arbitrary"),
            vmem_limit_bytes=_VMEM_LIMIT_BYTES),
    )(x, gamma, beta, gmap, gmapT)

    # ---- Stage 2: normalize + q/k/v projections (bf16 storage) --------------
    q, k, v = pl.pallas_call(
        _norm_qkv_kernel,
        out_shape=(jax.ShapeDtypeStruct((B, HW, C), jnp.bfloat16),
                   jax.ShapeDtypeStruct((B, HW, C), jnp.bfloat16),
                   jax.ShapeDtypeStruct((B, HW, C), jnp.bfloat16)),
        grid=(B, HW // tn),
        in_specs=[
            row_spec2,                                          # x
            stat_spec2, stat_spec2,                             # scale, shift
            mat_spec2, vec_spec2,                               # wq, bq
            mat_spec2, vec_spec2,                               # wk, bk
            mat_spec2, vec_spec2,                               # wv, bv
        ],
        out_specs=(row_spec2, row_spec2, row_spec2),
        compiler_params=pltpu.CompilerParams(
            dimension_semantics=("parallel", "parallel"),
            vmem_limit_bytes=_VMEM_LIMIT_BYTES),
    )(x, gn_scale, gn_shift, wq, bq, wk, bk, wv, bv)

    # ---- Stage 3: flash attention + proj_out + residual ---------------------
    out = pl.pallas_call(
        _flash_attn_kernel,
        out_shape=jax.ShapeDtypeStruct((B, HW, C), x.dtype),
        grid=(B, HW // tq, HW // tkv),
        in_specs=[
            pl.BlockSpec((1, tq, C), lambda b, i, j: (b, i, 0)),   # q
            pl.BlockSpec((1, tkv, C), lambda b, i, j: (b, j, 0)),  # k
            pl.BlockSpec((1, tkv, C), lambda b, i, j: (b, j, 0)),  # v
            pl.BlockSpec((1, tq, C), lambda b, i, j: (b, i, 0)),   # x (residual)
            pl.BlockSpec((C, C), lambda b, i, j: (0, 0)),          # wp
            pl.BlockSpec((1, C), lambda b, i, j: (0, 0)),          # bp
        ],
        out_specs=pl.BlockSpec((1, tq, C), lambda b, i, j: (b, i, 0)),
        scratch_shapes=[
            pltpu.VMEM((tq, 1), jnp.float32),   # running max
            pltpu.VMEM((tq, 1), jnp.float32),   # running denominator
            pltpu.VMEM((tq, C), jnp.float32),   # f32 accumulator
        ],
        compiler_params=pltpu.CompilerParams(
            dimension_semantics=("parallel", "parallel", "arbitrary"),
            vmem_limit_bytes=_VMEM_LIMIT_BYTES),
    )(q, k, v, x, wp, bp)

    # (B, HW, C) -> NCHW
    return jnp.transpose(out.reshape(B, H, W, C), (0, 3, 1, 2))


# ---------------------------------------------------------------------------
# Pure-JAX reference (matches the PyTorch forward exactly, f32 throughout).
# ---------------------------------------------------------------------------
def reference(x, params, *, num_groups=32, eps=1e-6):
    B, C, H, W = x.shape
    xr = x.reshape(B, num_groups, C // num_groups, H, W)
    mean = xr.mean(axis=(2, 3, 4), keepdims=True)
    var = xr.var(axis=(2, 3, 4), keepdims=True)
    h = ((xr - mean) / jnp.sqrt(var + eps)).reshape(B, C, H, W)
    h = h * params["gamma"][None, :, None, None] + params["beta"][None, :, None, None]

    def conv1x1(a, w, b):
        return jnp.einsum("bchw,oc->bohw", a, w) + b[None, :, None, None]

    q = conv1x1(h, params["wq"], params["bq"])
    k = conv1x1(h, params["wk"], params["bk"])
    v = conv1x1(h, params["wv"], params["bv"])
    q = q.reshape(B, C, H * W).transpose(0, 2, 1)
    k = k.reshape(B, C, H * W)
    w_ = jnp.einsum("bic,bcj->bij", q, k) * (int(C) ** (-0.5))
    w_ = jax.nn.softmax(w_, axis=2)
    v = v.reshape(B, C, H * W)
    h_ = jnp.einsum("bcj,bij->bci", v, w_).reshape(B, C, H, W)
    h_ = conv1x1(h_, params["wp"], params["bp"])
    return x + h_


if __name__ == "__main__":
    # GroupNorm uses 32 groups, so channels must be a multiple of 32.
    # HW = 32*32 = 1024 with 256-row attention tiles exercises the tiled
    # online-softmax path (4x4 kv/q tiles per batch element).
    B, C, H, W = 2, 128, 32, 32
    key = jax.random.PRNGKey(0)
    keys = jax.random.split(key, 11)

    params = {
        "gamma": 1.0 + 0.1 * jax.random.normal(keys[0], (C,), jnp.float32),
        "beta": 0.1 * jax.random.normal(keys[1], (C,), jnp.float32),
        "wq": 0.05 * jax.random.normal(keys[2], (C, C), jnp.float32),
        "bq": 0.01 * jax.random.normal(keys[3], (C,), jnp.float32),
        "wk": 0.05 * jax.random.normal(keys[4], (C, C), jnp.float32),
        "bk": 0.01 * jax.random.normal(keys[5], (C,), jnp.float32),
        "wv": 0.05 * jax.random.normal(keys[6], (C, C), jnp.float32),
        "bv": 0.01 * jax.random.normal(keys[7], (C,), jnp.float32),
        "wp": 0.05 * jax.random.normal(keys[8], (C, C), jnp.float32),
        "bp": 0.01 * jax.random.normal(keys[9], (C,), jnp.float32),
    }
    x = jax.random.normal(keys[10], (B, C, H, W), jnp.float32)

    out = attn_block_2d(x, params, num_groups=32, eps=1e-6)
    out = jax.block_until_ready(out)

    ref = reference(x, params, num_groups=32, eps=1e-6)
    assert out.shape == ref.shape
    err = jnp.max(jnp.abs(out - ref))
    # bf16 MXU operands (f32 accumulation) => looser tolerance than pure f32.
    assert jnp.allclose(out, ref, atol=3e-2, rtol=3e-2), f"max abs err {err}"

    print("KERNEL_OK")
</pallas_src>

<mosaic_0001>
module attributes {stable_mosaic.version = 11 : i64} {
  func.func @_gn_stats_kernel(%arg0: i32, %arg1: i32, %arg2: memref<1x512x128xf32, #tpu.memory_space<vmem>>, %arg3: memref<1x128xf32, #tpu.memory_space<vmem>>, %arg4: memref<1x128xf32, #tpu.memory_space<vmem>>, %arg5: memref<128x32xf32, #tpu.memory_space<vmem>>, %arg6: memref<32x128xf32, #tpu.memory_space<vmem>>, %arg7: memref<1x1x128xf32, #tpu.memory_space<vmem>>, %arg8: memref<1x1x128xf32, #tpu.memory_space<vmem>>) attributes {dimension_semantics = [#tpu.dimension_semantics<parallel>, #tpu.dimension_semantics<arbitrary>], iteration_bounds = array<i64: 2, 2>, scalar_prefetch = 0 : i64, scratch_operands = 0 : i64, tpu.core_type = #tpu.core_type<tc>, window_params = [{transform_indices = @transform_0, window_bounds = array<i64: 1, 512, 128>}, {pipeline_mode = #tpu.pipeline_mode<synchronous>, transform_indices = @transform_1, window_bounds = array<i64: 1, 128>}, {pipeline_mode = #tpu.pipeline_mode<synchronous>, transform_indices = @transform_2, window_bounds = array<i64: 1, 128>}, {pipeline_mode = #tpu.pipeline_mode<synchronous>, transform_indices = @transform_3, window_bounds = array<i64: 128, 32>}, {pipeline_mode = #tpu.pipeline_mode<synchronous>, transform_indices = @transform_4, window_bounds = array<i64: 32, 128>}, {transform_indices = @transform_5, window_bounds = array<i64: 1, 1, 128>}, {transform_indices = @transform_6, window_bounds = array<i64: 1, 1, 128>}]} {
    %c0_i32 = arith.constant 0 : i32
    %0 = arith.cmpi eq, %arg1, %c0_i32 : i32
    %1 = arith.extui %0 : i1 to i32
    %c0_i32_0 = arith.constant 0 : i32
    %2 = arith.cmpi ne, %1, %c0_i32_0 : i32
    scf.if %2 {
      %cst_17 = arith.constant 0.000000e+00 : f32
      %25 = vector.broadcast %cst_17 : f32 to vector<1x1x128xf32>
      %c0_18 = arith.constant 0 : index
      %c0_19 = arith.constant 0 : index
      %c0_20 = arith.constant 0 : index
      %26 = vector.load %arg7[%c0_18, %c0_19, %c0_20] : memref<1x1x128xf32, #tpu.memory_space<vmem>>, vector<1x1x128xf32>
      tpu.vector_store %arg7[%c0_18, %c0_19, %c0_20], %25 {strides = array<i32>} : memref<1x1x128xf32, #tpu.memory_space<vmem>>, vector<1x1x128xf32>,
      %cst_21 = arith.constant 0.000000e+00 : f32
      %27 = vector.broadcast %cst_21 : f32 to vector<1x1x128xf32>
      %c0_22 = arith.constant 0 : index
      %c0_23 = arith.constant 0 : index
      %c0_24 = arith.constant 0 : index
      %28 = vector.load %arg8[%c0_22, %c0_23, %c0_24] : memref<1x1x128xf32, #tpu.memory_space<vmem>>, vector<1x1x128xf32>
      tpu.vector_store %arg8[%c0_22, %c0_23, %c0_24], %27 {strides = array<i32>} : memref<1x1x128xf32, #tpu.memory_space<vmem>>, vector<1x1x128xf32>,
    } else {
    }
    %c0 = arith.constant 0 : index
    %c0_1 = arith.constant 0 : index
    %c0_2 = arith.constant 0 : index
    %3 = vector.load %arg2[%c0, %c0_1, %c0_2] : memref<1x512x128xf32, #tpu.memory_space<vmem>>, vector<1x512x128xf32>
    %4 = vector.shape_cast %3 : vector<1x512x128xf32> to vector<512x128xf32>
    %c0_3 = arith.constant 0 : index
    %c0_4 = arith.constant 0 : index
    %c0_5 = arith.constant 0 : index
    %5 = vector.load %arg7[%c0_3, %c0_4, %c0_5] : memref<1x1x128xf32, #tpu.memory_space<vmem>>, vector<1x1x128xf32>
    %6 = vector.shape_cast %5 : vector<1x1x128xf32> to vector<1x128xf32>
    %cst = arith.constant dense<0.000000e+00> : vector<128xf32>
    %7 = vector.multi_reduction <add>, %4, %cst [0] : vector<512x128xf32> to vector<128xf32>
    %8 = vector.shape_cast %7 : vector<128xf32> to vector<1x128xf32>
    %9 = arith.addf %6, %8 : vector<1x128xf32>
    %c0_6 = arith.constant 0 : index
    %c0_7 = arith.constant 0 : index
    %c0_8 = arith.constant 0 : index
    %10 = vector.load %arg7[%c0_6, %c0_7, %c0_8] : memref<1x1x128xf32, #tpu.memory_space<vmem>>, vector<1x1x128xf32>
    %11 = vector.shape_cast %10 : vector<1x1x128xf32> to vector<1x128xf32>
    %12 = vector.shape_cast %9 : vector<1x128xf32> to vector<1x1x128xf32>
    tpu.vector_store %arg7[%c0_6, %c0_7, %c0_8], %12 {strides = array<i32>} : memref<1x1x128xf32, #tpu.memory_space<vmem>>, vector<1x1x128xf32>,
    %c0_9 = arith.constant 0 : index
    %c0_10 = arith.constant 0 : index
    %c0_11 = arith.constant 0 : index
    %13 = vector.load %arg8[%c0_9, %c0_10, %c0_11] : memref<1x1x128xf32, #tpu.memory_space<vmem>>, vector<1x1x128xf32>
    %14 = vector.shape_cast %13 : vector<1x1x128xf32> to vector<1x128xf32>
    %15 = arith.mulf %4, %4 : vector<512x128xf32>
    %cst_12 = arith.constant dense<0.000000e+00> : vector<128xf32>
    %16 = vector.multi_reduction <add>, %15, %cst_12 [0] : vector<512x128xf32> to vector<128xf32>
    %17 = vector.shape_cast %16 : vector<128xf32> to vector<1x128xf32>
    %18 = arith.addf %14, %17 : vector<1x128xf32>
    %c0_13 = arith.constant 0 : index
    %c0_14 = arith.constant 0 : index
    %c0_15 = arith.constant 0 : index
    %19 = vector.load %arg8[%c0_13, %c0_14, %c0_15] : memref<1x1x128xf32, #tpu.memory_space<vmem>>, vector<1x1x128xf32>
    %20 = vector.shape_cast %19 : vector<1x1x128xf32> to vector<1x128xf32>
    %21 = vector.shape_cast %18 : vector<1x128xf32> to vector<1x1x128xf32>
    tpu.vector_store %arg8[%c0_13, %c0_14, %c0_15], %21 {strides = array<i32>} : memref<1x1x128xf32, #tpu.memory_space<vmem>>, vector<1x1x128xf32>,
    %c1_i32 = arith.constant 1 : i32
    %22 = arith.cmpi eq, %arg1, %c1_i32 : i32
    %23 = arith.extui %22 : i1 to i32
    %c0_i32_16 = arith.constant 0 : i32
    %24 = arith.cmpi ne, %23, %c0_i32_16 : i32
    scf.if %24 {
      %c0_17 = arith.constant 0 : index
      %c0_18 = arith.constant 0 : index
      %c0_19 = arith.constant 0 : index
      %25 = vector.load %arg7[%c0_17, %c0_18, %c0_19] : memref<1x1x128xf32, #tpu.memory_space<vmem>>, vector<1x1x128xf32>
      %26 = vector.shape_cast %25 : vector<1x1x128xf32> to vector<1x128xf32>
      %c0_20 = arith.constant 0 : index
      %c0_21 = arith.constant 0 : index
      %c0_22 = arith.constant 0 : index
      %27 = vector.load %arg8[%c0_20, %c0_21, %c0_22] : memref<1x1x128xf32, #tpu.memory_space<vmem>>, vector<1x1x128xf32>
      %28 = vector.shape_cast %27 : vector<1x1x128xf32> to vector<1x128xf32>
      %c0_23 = arith.constant 0 : index
      %c0_24 = arith.constant 0 : index
      %29 = vector.load %arg5[%c0_23, %c0_24] : memref<128x32xf32, #tpu.memory_space<vmem>>, vector<128x32xf32>
      %c0_25 = arith.constant 0 : index
      %c0_26 = arith.constant 0 : index
      %30 = vector.load %arg6[%c0_25, %c0_26] : memref<32x128xf32, #tpu.memory_space<vmem>>, vector<32x128xf32>
      %cst_27 = arith.constant dense<0.000000e+00> : vector<1x32xf32>
      %31 = tpu.matmul %26, %29, %cst_27 {dimension_numbers = #tpu.dot_dimension_numbers<[1], [0], [0], [1], [0, 0, 1, 1], [], []>} : vector<1x128xf32>, vector<128x32xf32>, vector<1x32xf32> -> vector<1x32xf32>
      %cst_28 = arith.constant 2.44140625E-4 : f32
      %32 = vector.broadcast %cst_28 : f32 to vector<1x32xf32>
      %33 = arith.mulf %31, %32 : vector<1x32xf32>
      %cst_29 = arith.constant dense<0.000000e+00> : vector<1x32xf32>
      %34 = tpu.matmul %28, %29, %cst_29 {dimension_numbers = #tpu.dot_dimension_numbers<[1], [0], [0], [1], [0, 0, 1, 1], [], []>} : vector<1x128xf32>, vector<128x32xf32>, vector<1x32xf32> -> vector<1x32xf32>
      %cst_30 = arith.constant 2.44140625E-4 : f32
      %35 = vector.broadcast %cst_30 : f32 to vector<1x32xf32>
      %36 = arith.mulf %34, %35 : vector<1x32xf32>
      %37 = arith.mulf %33, %33 : vector<1x32xf32>
      %38 = arith.subf %36, %37 : vector<1x32xf32>
      %cst_31 = arith.constant 9.99999997E-7 : f32
      %39 = vector.broadcast %cst_31 : f32 to vector<1x32xf32>
      %40 = arith.addf %38, %39 : vector<1x32xf32>
      %41 = math.rsqrt %40 : vector<1x32xf32>
      %cst_32 = arith.constant dense<0.000000e+00> : vector<1x128xf32>
      %42 = tpu.matmul %33, %30, %cst_32 {dimension_numbers = #tpu.dot_dimension_numbers<[1], [0], [0], [1], [0, 0, 1, 1], [], []>} : vector<1x32xf32>, vector<32x128xf32>, vector<1x128xf32> -> vector<1x128xf32>
      %cst_33 = arith.constant dense<0.000000e+00> : vector<1x128xf32>
      %43 = tpu.matmul %41, %30, %cst_33 {dimension_numbers = #tpu.dot_dimension_numbers<[1], [0], [0], [1], [0, 0, 1, 1], [], []>} : vector<1x32xf32>, vector<32x128xf32>, vector<1x128xf32> -> vector<1x128xf32>
      %c0_34 = arith.constant 0 : index
      %c0_35 = arith.constant 0 : index
      %44 = vector.load %arg3[%c0_34, %c0_35] : memref<1x128xf32, #tpu.memory_space<vmem>>, vector<1x128xf32>
      %45 = arith.mulf %43, %44 : vector<1x128xf32>
      %c0_36 = arith.constant 0 : index
      %c0_37 = arith.constant 0 : index
      %c0_38 = arith.constant 0 : index
      %46 = vector.load %arg7[%c0_36, %c0_37, %c0_38] : memref<1x1x128xf32, #tpu.memory_space<vmem>>, vector<1x1x128xf32>
      %47 = vector.shape_cast %46 : vector<1x1x128xf32> to vector<1x128xf32>
      %48 = vector.shape_cast %45 : vector<1x128xf32> to vector<1x1x128xf32>
      tpu.vector_store %arg7[%c0_36, %c0_37, %c0_38], %48 {strides = array<i32>} : memref<1x1x128xf32, #tpu.memory_space<vmem>>, vector<1x1x128xf32>,
      %c0_39 = arith.constant 0 : index
      %c0_40 = arith.constant 0 : index
      %49 = vector.load %arg4[%c0_39, %c0_40] : memref<1x128xf32, #tpu.memory_space<vmem>>, vector<1x128xf32>
      %50 = arith.mulf %42, %45 : vector<1x128xf32>
      %51 = arith.subf %49, %50 : vector<1x128xf32>
      %c0_41 = arith.constant 0 : index
      %c0_42 = arith.constant 0 : index
      %c0_43 = arith.constant 0 : index
      %52 = vector.load %arg8[%c0_41, %c0_42, %c0_43] : memref<1x1x128xf32, #tpu.memory_space<vmem>>, vector<1x1x128xf32>
      %53 = vector.shape_cast %52 : vector<1x1x128xf32> to vector<1x128xf32>
      %54 = vector.shape_cast %51 : vector<1x128xf32> to vector<1x1x128xf32>
      tpu.vector_store %arg8[%c0_41, %c0_42, %c0_43], %54 {strides = array<i32>} : memref<1x1x128xf32, #tpu.memory_space<vmem>>, vector<1x1x128xf32>,
    } else {
    }
    return
  }
  func.func @transform_0(%arg0: i32, %arg1: i32) -> (i32, i32, i32) {
    %c0_i32 = arith.constant 0 : i32
    %c0_i32_0 = arith.constant 0 : i32
    return %arg0, %arg1, %c0_i32 : i32, i32, i32
  }
  func.func @transform_1(%arg0: i32, %arg1: i32) -> (i32, i32) {
    %c0_i32 = arith.constant 0 : i32
    %c0_i32_0 = arith.constant 0 : i32
    %c0_i32_1 = arith.constant 0 : i32
    return %c0_i32, %c0_i32_0 : i32, i32
  }
  func.func @transform_2(%arg0: i32, %arg1: i32) -> (i32, i32) {
    %c0_i32 = arith.constant 0 : i32
    %c0_i32_0 = arith.constant 0 : i32
    %c0_i32_1 = arith.constant 0 : i32
    return %c0_i32, %c0_i32_0 : i32, i32
  }
  func.func @transform_3(%arg0: i32, %arg1: i32) -> (i32, i32) {
    %c0_i32 = arith.constant 0 : i32
    %c0_i32_0 = arith.constant 0 : i32
    %c0_i32_1 = arith.constant 0 : i32
    return %c0_i32, %c0_i32_0 : i32, i32
  }
  func.func @transform_4(%arg0: i32, %arg1: i32) -> (i32, i32) {
    %c0_i32 = arith.constant 0 : i32
    %c0_i32_0 = arith.constant 0 : i32
    %c0_i32_1 = arith.constant 0 : i32
    return %c0_i32, %c0_i32_0 : i32, i32
  }
  func.func @transform_5(%arg0: i32, %arg1: i32) -> (i32, i32, i32) {
    %c0_i32 = arith.constant 0 : i32
    %c0_i32_0 = arith.constant 0 : i32
    %c0_i32_1 = arith.constant 0 : i32
    return %arg0, %c0_i32, %c0_i32_0 : i32, i32, i32
  }
  func.func @transform_6(%arg0: i32, %arg1: i32) -> (i32, i32, i32) {
    %c0_i32 = arith.constant 0 : i32
    %c0_i32_0 = arith.constant 0 : i32
    %c0_i32_1 = arith.constant 0 : i32
    return %arg0, %c0_i32, %c0_i32_0 : i32, i32, i32
  }
}

</mosaic_0001>

<bundles_post_ra>
// kernel: tpu_custom_call.1
= control target key start
LH: loop header
LB: loop body
LE: loop exit
PB: predicated region body
PF: predicated region fallthrough
CT: control target
= control target key end

     0   :  { %s1928_s0 = inlined_call_operand.hbm [shape: f32[2,1024,128], index: 0, kind: input, shape index: {}]   ;;  %s1929_s1 = inlined_call_operand.vmem [shape: f32[1,128], index: 1, kind: input, shape index: {}]   ;;  %s1930_s2 = inlined_call_operand.vmem [shape: f32[1,128], index: 2, kind: input, shape index: {}]   ;;  %s1931_s3 = inlined_call_operand.vmem [shape: f32[128,32], index: 3, kind: input, shape index: {}]   ;;  %s1932_s4 = inlined_call_operand.vmem [shape: f32[32,128], index: 4, kind: input, shape index: {}]   ;;  %s1933_s5 = inlined_call_operand.hbm [shape: f32[2,1,128], index: 5, kind: output, shape index: {0}]   ;;  %s1934_s6 = inlined_call_operand.hbm [shape: f32[2,1,128], index: 6, kind: output, shape index: {1}]  }
   0x1   :  { %1943 = sst [smem:[#allocation17_spill]] %s1928_s0 }
   0x2   :  { %1944 = sst [smem:[#allocation18_spill]] %s1929_s1 }
   0x3   :  { %1945 = sst [smem:[#allocation19_spill]] %s1933_s5 }
   0x4   :  { %1946 = sst [smem:[#allocation20_spill]] %s1934_s6 }
   0x5   :  { %12 = vsyncpa [#allocation3], 0 }
   0x6   :  { %14 = vsyncpa [#allocation3 + $0x1], 0 }
   0x7   :  { %15 = vsyncpa [#allocation4], 0 }
   0x8   :  { %17 = vsyncpa [#allocation4 + $0x1], 0 }
   0x9   :  { %18 = vsyncpa [#allocation7], 0 }
   0xa   :  { %20 = vsyncpa [#allocation7 + $0x1], 0  ;;  %s1529_s21 = smov 0   ;;  %s1531_s22 = smov 0  }
   0xb   :  { %s1533_s23 = smov 0   ;;  %s1535_s24 = smov 0  }
   0xc   :  { %s1537_s25 = smov 0   ;;  %s1539_s26 = smov 0  }
   0xd   :  { %s1541_s27 = smov 0   ;;  %s1543_s28 = smov 0  }
   0xe   :  { %s1545_s29 = smov 0   ;;  %s1547_s30 = smov 0  }
   0xf   :  { %s1549_s7 = smov 0  }
  0x10 LB: > { %1947 = sst [smem:[#allocation11_spill]] %s1476_s29  ;;  %s1038_s8 = sadd.s32 4294967295, %s1484_s7   ;;  %s1484_s7 = sphi %s1549_s7, %s26_s7   ;;  %s1480_s30 = sphi %s1547_s30, %s1977_s30   ;;  %s1476_s29 = sphi %s1545_s29, %s1968_s29   ;;  %s1472_s28 = sphi %s1543_s28, %s1976_s28   ;;  %s1468_s27 = sphi %s1541_s27, %s1967_s27   ;;  %s1464_s26 = sphi %s1539_s26, %s1975_s26   ;;  %s1460_s25 = sphi %s1537_s25, %s1974_s25   ;;  %s1456_s24 = sphi %s1535_s24, %s1973_s24   ;;  %s1452_s23 = sphi %s1533_s23, %s1972_s23   ;;  %s1448_s22 = sphi %s1531_s22, %s1971_s22   ;;  %s1444_s21 = sphi %s1529_s21, %s1970_s21  }
  0x11   : > { %s1039_s9 = sadd.s32 4294967294, %s1484_s7   ;;  %s35_s10 = sadd.s32 1, %s1476_s29 }
  0x12   : > { %s38_s11 = sadd.s32 1, %s1480_s30  ;;  %p36_p0 = scmp.ge.s32.totalorder %s35_s10, 2 }
  0x13   : > { %s47_s12 = sadd.s32 1, %s1464_s26  ;;  %p54_p1 = scmp.ne.s32.totalorder %s1464_s26, %s1460_s25 }
  0x14   : > { %p55_p2 = scmp.eq.s32.totalorder %s1484_s7, 0  ;;  %s1979_s10 = smov (%p36_p0, %s35_s10), 0 }
  0x15   : > { %1948 = sst [smem:[#allocation12_spill]] %s1979_s10  ;;  %s1981_s11 = smov (!%p36_p0, %s38_s11), %s1480_s30 }
  0x16   : > { %s43_s13 = ssub.s32 %s1476_s29, %s1979_s10  ;;  %p1595_p3 = por %p55_p2, %p54_p1 }
  0x17   : > { %p40_p4 = scmp.ge.s32.totalorder %s1981_s11, 2  ;;  %p60_p5 = scmp.ne.s32.totalorder %s1460_s25, %s1456_s24 }
  0x18   : > { %p61_p6 = scmp.eq.s32.totalorder %s1038_s8, 0  ;;  %s157_s15 = sadd.s32 1, %s1452_s23 }
  0x19   : > { %s1983_s11 = smov (%p40_p4, %s1981_s11), 0  ;;  %p167_p8 = scmp.ne.s32.totalorder %s1452_s23, %s1448_s22 }
  0x1a   : > { %1950 = sst [smem:[#allocation13_spill]] %s1983_s11  ;;  %p1603_p7 = por %p61_p6, %p60_p5 }
  0x1b   : > { %s42_s17 = ssub.s32 %s1480_s30, %s1983_s11  ;;  %p168_p9 = scmp.eq.s32.totalorder %s1038_s8, 3 }
  0x1c   : > { %s44_s18 = sor.u32 %s43_s13, %s42_s17  ;;  %p155_p10 = scmp.eq.s32.totalorder %s42_s17, 0 }
  0x1d   : > { %p45_p11 = scmp.eq.s32.totalorder %s44_s18, 0  ;;  %p1611_p12 = por %p168_p9, %p167_p8 }
  0x1e   : > { %s1616_s20 = scalar_select %p155_p10, %s1452_s23, %s157_s15  }
  0x1f   : > { %s1952_s19 = scalar_select %p1611_p12, 1, 0 }
  0x20   : > { %1954 = sst [smem:[#allocation15_spill]] %s1616_s20  ;;  %p173_p13 = scmp.ne.s32.totalorder %s1448_s22, %s1444_s21 }
  0x21   : > { %1953 = sst [smem:[#allocation14_spill]] %s1952_s19  ;;  %p174_p0 = scmp.eq.s32.totalorder %s1039_s9, 3 }
  0x22   : > { %s1619_s24 = scalar_select %p45_p11, %s1464_s26, %s47_s12  }
  0x23   : > { %p1209_p1 = scmp.lt.s32.totalorder %s1484_s7, 4  ;;  %p1624_p2 = por %p174_p0, %p173_p13 }
  0x24   : > { %1955 = sst [smem:[#allocation16_spill]] %s1619_s24  ;;  %s232_s8 = sand.u32 1, %s1464_s26  }
  0x25   : > { %s1042_s13 = sshll.u32 %s232_s8, 9  ;;  %s1043_s17 = sshll.u32 %s1476_s29, 6 }
  0x26   : > { %s1044_s18 = sshll.u32 %s1480_s30, 7  ;;  %s236_s11 = scalar_lea.vmem [#allocation2], %s1042_s13 }
  0x27   : > { %s245_s6 = sshll.u32 %s236_s11, 4  ;;  %s242_s5 = sadd.s32 %s1044_s18, %s1043_s17  ;;  %s246_s6 = int_to_ptr.vmem [resolvable:$true] %s245_s6 }
  0x28   : > { %s1045_s19 = sshll.u32 %s242_s5, 7  ;;  %p1633_p4 = pnand %p1209_p1, %p1595_p3 }
  0x29   : > { %s1958_s0 = sld [smem:[#allocation17_spill]]  ;;  %s233_s20 = scalar_lea.sflag [#allocation3], %s232_s8 }
  0x2a   : > { %p1308_p5 = pneg %p1633_p4  ;;  %s1319_s29 = scalar_lea.vmem %s246_s6, 8192 }
  0x2b   : > { %p1320_p6 = scmp.ne.s32.totalorder %s246_s6, %s1319_s29  ;;  %s1486_s11 = smov [#allocation2]  }
  0x2c   : > { %s1324_s13 = sshll.u32 %s1486_s11, 4  ;;  %s1325_s13 = int_to_ptr.vmem [resolvable:$false] %s1324_s13 }
  0x2d   : > { %p1322_p8 = pnand %p1320_p6, %p1308_p5  ;;  %s1326_s5 = scalar_lea.vmem %s1325_s13, 16384 }
  0x2e   : > { %p1327_p3 = scmp.lt.s32.totalorder %s246_s6, %s1325_s13  ;;  %p1328_p10 = scmp.lt.s32.totalorder %s1326_s5, %s1319_s29 }
  0x2f   : > { %s244_s24 = scalar_lea.hbm %s1958_s0, %s1045_s19  ;;  %p1323_p9 = pneg %p1322_p8 }
  0x30   : > { %p1329_p11 = por %p1328_p10, %p1327_p3 }
  0x32   : > { %p1330_p13 = pnand %p1329_p11, %p1323_p9 }
  0x34   : > { %1333 = shalt.err (!%p1330_p13)
}
  0x35   : > { %s1487_s14 = smov 128   ;;  %s1488_s19 = smov 8  }
  0x36   : > { %1201 = dma.hbm_to_vmem [thread:$0]  (!%p1633_p4), %s244_s24, 8192, %s246_s6, %s233_s20, %s1487_s14, %s1487_s14, %s1488_s19  }
  0x37   : > { %p1046_p0 = scmp.ge.s32.totalorder %s1484_s7, 1  ;;  %p253_p1 = scmp.lt.s32.totalorder %s1484_s7, 5 }
  0x39   : > { %p254_p5 = pnand %p1046_p0, %p253_p1 }
  0x3a   : > { %s259_s8 = sand.u32 (!%p254_p5), 1, %s1460_s25  }
  0x3b   : > { %257 = sbr.rel (%p254_p5) target bundleno = 713 (0x2c9), region = 40  ;;  %s1047_s17 = sshll.u32 (!%p254_p5), %s259_s8, 9 }
  0x3c   : > { %s260_s18 = scalar_lea.sflag (!%p254_p5), [#allocation3], %s259_s8  ;;  %s1647_s29 = scalar_lea.vmem (!%p254_p5), [#allocation2], %s1047_s17 }
  0x40   : > { %1431 = dma.done.wait (%p1603_p7), %s260_s18, 8192  }
  0x41   : > { %1433 = vsyncadd (%p1603_p7), %s260_s18, 4294959104  ;;  %s1654_s9 = sand.u32 1, %s1448_s22   ;;  %p1048_p4 = scmp.ne.s32.totalorder %s1468_s27, 0 }
  0x42   : > { %s1657_s6 = scalar_lea.vmem [#allocation5], %s1654_s9  ;;  %s1660_s20 = scalar_lea.vmem [#allocation6], %s1654_s9 }
  0x43   : > { %299 = sbr.rel (%p1048_p4) target bundleno = 74 (0x4a), region = 48 }
  0x48   : > { %v1489_v0 = vmov 0.0  }
  0x49   : > { %300 = vst [vmem:[%s1657_s6] sm:$0x1] %v1489_v0  ;;  %301 = vst [vmem:[%s1660_s20] sm:$0x1] %v1489_v0 }
  0x4a PF: > { %v302_v1 = vld [vmem:[%s1647_s29] sm:$0xff]  ;;  %v303_v2 = vld [vmem:[%s1647_s29 + $0x8] sm:$0xff]  ;;  %v304_v3 = vld [vmem:[%s1647_s29 + $0x10] sm:$0xff]  ;;  %p1049_p7 = scmp.ne.s32.totalorder %s1468_s27, 1 }
  0x4b   : > { %v305_v4 = vld [vmem:[%s1647_s29 + $0x18] sm:$0xff]  ;;  %v367_v5 = vadd.f32 %v303_v2, %v302_v1  ;;  %v439_v6 = vmul.f32 %v302_v1, %v302_v1  ;;  %v440_v7 = vmul.f32 %v303_v2, %v303_v2  ;;  %v441_v8 = vmul.f32 %v304_v3, %v304_v3  ;;  %v306_v9 = vld [vmem:[%s1647_s29 + $0x20] sm:$0xff]  ;;  %v307_v13 = vld [vmem:[%s1647_s29 + $0x28] sm:$0xff]  ;;  %s1959_s1 = sld [smem:[#allocation18_spill]] (!%p1049_p7) }
  0x4c   : > { %v442_v11 = vmul.f32 %v305_v4, %v305_v4  ;;  %v443_v15 = vmul.f32 %v306_v9, %v306_v9  ;;  %v308_v17 = vld [vmem:[%s1647_s29 + $0x30] sm:$0xff]  ;;  %v444_v19 = vmul.f32 %v307_v13, %v307_v13  ;;  %v309_v21 = vld [vmem:[%s1647_s29 + $0x38] sm:$0xff]  ;;  %v310_v25 = vld [vmem:[%s1647_s29 + $0x40] sm:$0xff] }
  0x4d   : > { %v368_v10 = vadd.f32 %v367_v5, %v304_v3  ;;  %v503_v12 = vadd.f32 %v440_v7, %v439_v6  ;;  %v445_v23 = vmul.f32 %v308_v17, %v308_v17  ;;  %v446_v27 = vmul.f32 %v309_v21, %v309_v21  ;;  %v311_v29 = vld [vmem:[%s1647_s29 + $0x48] sm:$0xff]  ;;  %v312_v33 = vld [vmem:[%s1647_s29 + $0x50] sm:$0xff]  ;;  %v313_v37 = vld [vmem:[%s1647_s29 + $0x58] sm:$0xff] }
  0x4e   : > { %v447_v31 = vmul.f32 %v310_v25, %v310_v25  ;;  %v448_v35 = vmul.f32 %v311_v29, %v311_v29  ;;  %v449_v39 = vmul.f32 %v312_v33, %v312_v33  ;;  %v314_v41 = vld [vmem:[%s1647_s29 + $0x60] sm:$0xff]  ;;  %v450_v43 = vmul.f32 %v313_v37, %v313_v37  ;;  %v315_v45 = vld [vmem:[%s1647_s29 + $0x68] sm:$0xff]  ;;  %v316_v49 = vld [vmem:[%s1647_s29 + $0x70] sm:$0xff] }
  0x4f   : > { %v369_v14 = vadd.f32 %v368_v10, %v305_v4  ;;  %v504_v16 = vadd.f32 %v503_v12, %v441_v8  ;;  %v451_v47 = vmul.f32 %v314_v41, %v314_v41  ;;  %v452_v51 = vmul.f32 %v315_v45, %v315_v45  ;;  %v317_v53 = vld [vmem:[%s1647_s29 + $0x78] sm:$0xff]  ;;  %v318_v57 = vld [vmem:[%s1647_s29 + $0x80] sm:$0xff]  ;;  %v319_v61 = vld [vmem:[%s1647_s29 + $0x88] sm:$0xff] }
  0x50   : > { %v453_v55 = vmul.f32 %v316_v49, %v316_v49  ;;  %v454_v59 = vmul.f32 %v317_v53, %v317_v53  ;;  %v455_v63 = vmul.f32 %v318_v57, %v318_v57  ;;  %v320_v1 = vld [vmem:[%s1647_s29 + $0x90] sm:$0xff]  ;;  %v456_v3 = vmul.f32 %v319_v61, %v319_v61  ;;  %v321_v5 = vld [vmem:[%s1647_s29 + $0x98] sm:$0xff] }
  0x51   : > { %v370_v18 = vadd.f32 %v369_v14, %v306_v9  ;;  %v505_v20 = vadd.f32 %v504_v16, %v442_v11  ;;  %v457_v7 = vmul.f32 %v320_v1, %v320_v1  ;;  %v322_v9 = vld [vmem:[%s1647_s29 + $0xa0] sm:$0xff]  ;;  %v458_v11 = vmul.f32 %v321_v5, %v321_v5 }
  0x53   : > { %v371_v22 = vadd.f32 %v370_v18, %v307_v13  ;;  %v506_v24 = vadd.f32 %v505_v20, %v443_v15  ;;  %v323_v13 = vld [vmem:[%s1647_s29 + $0xa8] sm:$0xff]  ;;  %v459_v15 = vmul.f32 %v322_v9, %v322_v9 }
  0x55   : > { %v372_v26 = vadd.f32 %v371_v22, %v308_v17  ;;  %v507_v28 = vadd.f32 %v506_v24, %v444_v19  ;;  %v324_v17 = vld [vmem:[%s1647_s29 + $0xb0] sm:$0xff]  ;;  %v460_v19 = vmul.f32 %v323_v13, %v323_v13 }
  0x57   : > { %v373_v30 = vadd.f32 %v372_v26, %v309_v21  ;;  %v508_v32 = vadd.f32 %v507_v28, %v445_v23  ;;  %v325_v21 = vld [vmem:[%s1647_s29 + $0xb8] sm:$0xff]  ;;  %v461_v23 = vmul.f32 %v324_v17, %v324_v17 }
  0x59   : > { %v374_v34 = vadd.f32 %v373_v30, %v310_v25  ;;  %v509_v36 = vadd.f32 %v508_v32, %v446_v27  ;;  %v326_v25 = vld [vmem:[%s1647_s29 + $0xc0] sm:$0xff]  ;;  %v462_v27 = vmul.f32 %v325_v21, %v325_v21 }
  0x5b   : > { %v375_v38 = vadd.f32 %v374_v34, %v311_v29  ;;  %v510_v40 = vadd.f32 %v509_v36, %v447_v31  ;;  %v327_v29 = vld [vmem:[%s1647_s29 + $0xc8] sm:$0xff]  ;;  %v463_v31 = vmul.f32 %v326_v25, %v326_v25 }
  0x5d   : > { %v376_v42 = vadd.f32 %v375_v38, %v312_v33  ;;  %v511_v44 = vadd.f32 %v510_v40, %v448_v35  ;;  %v328_v33 = vld [vmem:[%s1647_s29 + $0xd0] sm:$0xff]  ;;  %v464_v35 = vmul.f32 %v327_v29, %v327_v29 }
  0x5f   : > { %v377_v46 = vadd.f32 %v376_v42, %v313_v37  ;;  %v512_v48 = vadd.f32 %v511_v44, %v449_v39  ;;  %v329_v37 = vld [vmem:[%s1647_s29 + $0xd8] sm:$0xff]  ;;  %v465_v39 = vmul.f32 %v328_v33, %v328_v33 }
  0x61   : > { %v378_v50 = vadd.f32 %v377_v46, %v314_v41  ;;  %v513_v52 = vadd.f32 %v512_v48, %v450_v43  ;;  %v330_v41 = vld [vmem:[%s1647_s29 + $0xe0] sm:$0xff]  ;;  %v466_v43 = vmul.f32 %v329_v37, %v329_v37 }
  0x63   : > { %v379_v54 = vadd.f32 %v378_v50, %v315_v45  ;;  %v514_v56 = vadd.f32 %v513_v52, %v451_v47  ;;  %v331_v45 = vld [vmem:[%s1647_s29 + $0xe8] sm:$0xff]  ;;  %v467_v47 = vmul.f32 %v330_v41, %v330_v41 }
  0x65   : > { %v380_v58 = vadd.f32 %v379_v54, %v316_v49  ;;  %v515_v60 = vadd.f32 %v514_v56, %v452_v51  ;;  %v332_v49 = vld [vmem:[%s1647_s29 + $0xf0] sm:$0xff]  ;;  %v468_v51 = vmul.f32 %v331_v45, %v331_v45 }
  0x67   : > { %v381_v62 = vadd.f32 %v380_v58, %v317_v53  ;;  %v516_v0 = vadd.f32 %v515_v60, %v453_v55  ;;  %v333_v53 = vld [vmem:[%s1647_s29 + $0xf8] sm:$0xff]  ;;  %v469_v55 = vmul.f32 %v332_v49, %v332_v49 }
  0x69   : > { %v382_v2 = vadd.f32 %v381_v62, %v318_v57  ;;  %v517_v4 = vadd.f32 %v516_v0, %v454_v59  ;;  %v334_v57 = vld [vmem:[%s1647_s29 + $0x100] sm:$0xff]  ;;  %v470_v59 = vmul.f32 %v333_v53, %v333_v53 }
  0x6b   : > { %v383_v6 = vadd.f32 %v382_v2, %v319_v61  ;;  %v518_v8 = vadd.f32 %v517_v4, %v455_v63  ;;  %v335_v61 = vld [vmem:[%s1647_s29 + $0x108] sm:$0xff]  ;;  %v471_v63 = vmul.f32 %v334_v57, %v334_v57 }
  0x6d   : > { %v384_v10 = vadd.f32 %v383_v6, %v320_v1  ;;  %v519_v12 = vadd.f32 %v518_v8, %v456_v3  ;;  %v336_v1 = vld [vmem:[%s1647_s29 + $0x110] sm:$0xff]  ;;  %v472_v3 = vmul.f32 %v335_v61, %v335_v61 }
  0x6f   : > { %v385_v14 = vadd.f32 %v384_v10, %v321_v5  ;;  %v520_v16 = vadd.f32 %v519_v12, %v457_v7  ;;  %v337_v5 = vld [vmem:[%s1647_s29 + $0x118] sm:$0xff]  ;;  %v473_v7 = vmul.f32 %v336_v1, %v336_v1 }
  0x71   : > { %v386_v18 = vadd.f32 %v385_v14, %v322_v9  ;;  %v521_v20 = vadd.f32 %v520_v16, %v458_v11  ;;  %v338_v9 = vld [vmem:[%s1647_s29 + $0x120] sm:$0xff]  ;;  %v474_v11 = vmul.f32 %v337_v5, %v337_v5 }
  0x73   : > { %v387_v22 = vadd.f32 %v386_v18, %v323_v13  ;;  %v522_v24 = vadd.f32 %v521_v20, %v459_v15  ;;  %v339_v13 = vld [vmem:[%s1647_s29 + $0x128] sm:$0xff]  ;;  %v475_v15 = vmul.f32 %v338_v9, %v338_v9 }
  0x75   : > { %v388_v26 = vadd.f32 %v387_v22, %v324_v17  ;;  %v523_v28 = vadd.f32 %v522_v24, %v460_v19  ;;  %v340_v17 = vld [vmem:[%s1647_s29 + $0x130] sm:$0xff]  ;;  %v476_v19 = vmul.f32 %v339_v13, %v339_v13 }
  0x77   : > { %v389_v30 = vadd.f32 %v388_v26, %v325_v21  ;;  %v524_v32 = vadd.f32 %v523_v28, %v461_v23  ;;  %v341_v21 = vld [vmem:[%s1647_s29 + $0x138] sm:$0xff]  ;;  %v477_v23 = vmul.f32 %v340_v17, %v340_v17 }
  0x79   : > { %v390_v34 = vadd.f32 %v389_v30, %v326_v25  ;;  %v525_v36 = vadd.f32 %v524_v32, %v462_v27  ;;  %v342_v25 = vld [vmem:[%s1647_s29 + $0x140] sm:$0xff]  ;;  %v478_v27 = vmul.f32 %v341_v21, %v341_v21 }
  0x7b   : > { %v391_v38 = vadd.f32 %v390_v34, %v327_v29  ;;  %v526_v40 = vadd.f32 %v525_v36, %v463_v31  ;;  %v343_v29 = vld [vmem:[%s1647_s29 + $0x148] sm:$0xff]  ;;  %v479_v31 = vmul.f32 %v342_v25, %v342_v25 }
  0x7d   : > { %v392_v42 = vadd.f32 %v391_v38, %v328_v33  ;;  %v527_v44 = vadd.f32 %v526_v40, %v464_v35  ;;  %v344_v33 = vld [vmem:[%s1647_s29 + $0x150] sm:$0xff]  ;;  %v480_v35 = vmul.f32 %v343_v29, %v343_v29 }
  0x7f   : > { %v393_v46 = vadd.f32 %v392_v42, %v329_v37  ;;  %v528_v48 = vadd.f32 %v527_v44, %v465_v39  ;;  %v345_v37 = vld [vmem:[%s1647_s29 + $0x158] sm:$0xff]  ;;  %v481_v39 = vmul.f32 %v344_v33, %v344_v33 }
  0x81   : > { %v394_v50 = vadd.f32 %v393_v46, %v330_v41  ;;  %v529_v52 = vadd.f32 %v528_v48, %v466_v43  ;;  %v346_v41 = vld [vmem:[%s1647_s29 + $0x160] sm:$0xff]  ;;  %v482_v43 = vmul.f32 %v345_v37, %v345_v37 }
  0x83   : > { %v395_v54 = vadd.f32 %v394_v50, %v331_v45  ;;  %v530_v56 = vadd.f32 %v529_v52, %v467_v47  ;;  %v347_v45 = vld [vmem:[%s1647_s29 + $0x168] sm:$0xff]  ;;  %v483_v47 = vmul.f32 %v346_v41, %v346_v41 }
  0x85   : > { %v396_v58 = vadd.f32 %v395_v54, %v332_v49  ;;  %v531_v60 = vadd.f32 %v530_v56, %v468_v51  ;;  %v348_v49 = vld [vmem:[%s1647_s29 + $0x170] sm:$0xff]  ;;  %v484_v51 = vmul.f32 %v347_v45, %v347_v45 }
  0x87   : > { %v397_v62 = vadd.f32 %v396_v58, %v333_v53  ;;  %v532_v0 = vadd.f32 %v531_v60, %v469_v55  ;;  %v349_v53 = vld [vmem:[%s1647_s29 + $0x178] sm:$0xff]  ;;  %v485_v55 = vmul.f32 %v348_v49, %v348_v49 }
  0x89   : > { %v398_v2 = vadd.f32 %v397_v62, %v334_v57  ;;  %v533_v4 = vadd.f32 %v532_v0, %v470_v59  ;;  %v350_v57 = vld [vmem:[%s1647_s29 + $0x180] sm:$0xff]  ;;  %v486_v59 = vmul.f32 %v349_v53, %v349_v53 }
  0x8b   : > { %v399_v6 = vadd.f32 %v398_v2, %v335_v61  ;;  %v534_v8 = vadd.f32 %v533_v4, %v471_v63  ;;  %v351_v61 = vld [vmem:[%s1647_s29 + $0x188] sm:$0xff]  ;;  %v487_v63 = vmul.f32 %v350_v57, %v350_v57 }
  0x8d   : > { %v400_v10 = vadd.f32 %v399_v6, %v336_v1  ;;  %v535_v12 = vadd.f32 %v534_v8, %v472_v3  ;;  %v352_v1 = vld [vmem:[%s1647_s29 + $0x190] sm:$0xff]  ;;  %v488_v3 = vmul.f32 %v351_v61, %v351_v61 }
  0x8f   : > { %v401_v14 = vadd.f32 %v400_v10, %v337_v5  ;;  %v536_v16 = vadd.f32 %v535_v12, %v473_v7  ;;  %v353_v5 = vld [vmem:[%s1647_s29 + $0x198] sm:$0xff]  ;;  %v489_v7 = vmul.f32 %v352_v1, %v352_v1 }
  0x91   : > { %v402_v18 = vadd.f32 %v401_v14, %v338_v9  ;;  %v537_v20 = vadd.f32 %v536_v16, %v474_v11  ;;  %v354_v9 = vld [vmem:[%s1647_s29 + $0x1a0] sm:$0xff]  ;;  %v490_v11 = vmul.f32 %v353_v5, %v353_v5 }
  0x93   : > { %v403_v22 = vadd.f32 %v402_v18, %v339_v13  ;;  %v538_v24 = vadd.f32 %v537_v20, %v475_v15  ;;  %v355_v13 = vld [vmem:[%s1647_s29 + $0x1a8] sm:$0xff]  ;;  %v491_v15 = vmul.f32 %v354_v9, %v354_v9 }
  0x95   : > { %v404_v26 = vadd.f32 %v403_v22, %v340_v17  ;;  %v539_v28 = vadd.f32 %v538_v24, %v476_v19  ;;  %v356_v17 = vld [vmem:[%s1647_s29 + $0x1b0] sm:$0xff]  ;;  %v492_v19 = vmul.f32 %v355_v13, %v355_v13 }
  0x97   : > { %v405_v30 = vadd.f32 %v404_v26, %v341_v21  ;;  %v540_v32 = vadd.f32 %v539_v28, %v477_v23  ;;  %v357_v21 = vld [vmem:[%s1647_s29 + $0x1b8] sm:$0xff]  ;;  %v493_v23 = vmul.f32 %v356_v17, %v356_v17 }
  0x99   : > { %v406_v34 = vadd.f32 %v405_v30, %v342_v25  ;;  %v541_v36 = vadd.f32 %v540_v32, %v478_v27  ;;  %v358_v25 = vld [vmem:[%s1647_s29 + $0x1c0] sm:$0xff]  ;;  %v494_v27 = vmul.f32 %v357_v21, %v357_v21 }
  0x9b   : > { %v407_v38 = vadd.f32 %v406_v34, %v343_v29  ;;  %v542_v40 = vadd.f32 %v541_v36, %v479_v31  ;;  %v359_v29 = vld [vmem:[%s1647_s29 + $0x1c8] sm:$0xff]  ;;  %v495_v31 = vmul.f32 %v358_v25, %v358_v25 }
  0x9d   : > { %v408_v42 = vadd.f32 %v407_v38, %v344_v33  ;;  %v543_v44 = vadd.f32 %v542_v40, %v480_v35  ;;  %v360_v33 = vld [vmem:[%s1647_s29 + $0x1d0] sm:$0xff]  ;;  %v496_v35 = vmul.f32 %v359_v29, %v359_v29 }
  0x9f   : > { %v409_v46 = vadd.f32 %v408_v42, %v345_v37  ;;  %v544_v48 = vadd.f32 %v543_v44, %v481_v39  ;;  %v361_v37 = vld [vmem:[%s1647_s29 + $0x1d8] sm:$0xff]  ;;  %v497_v39 = vmul.f32 %v360_v33, %v360_v33 }
  0xa1   : > { %v410_v50 = vadd.f32 %v409_v46, %v346_v41  ;;  %v545_v52 = vadd.f32 %v544_v48, %v482_v43  ;;  %v362_v41 = vld [vmem:[%s1647_s29 + $0x1e0] sm:$0xff]  ;;  %v498_v43 = vmul.f32 %v361_v37, %v361_v37 }
  0xa3   : > { %v411_v54 = vadd.f32 %v410_v50, %v347_v45  ;;  %v546_v56 = vadd.f32 %v545_v52, %v483_v47  ;;  %v363_v45 = vld [vmem:[%s1647_s29 + $0x1e8] sm:$0xff]  ;;  %v499_v47 = vmul.f32 %v362_v41, %v362_v41 }
  0xa5   : > { %v412_v58 = vadd.f32 %v411_v54, %v348_v49  ;;  %v547_v60 = vadd.f32 %v546_v56, %v484_v51  ;;  %v364_v49 = vld [vmem:[%s1647_s29 + $0x1f0] sm:$0xff]  ;;  %v500_v51 = vmul.f32 %v363_v45, %v363_v45 }
  0xa7   : > { %v413_v62 = vadd.f32 %v412_v58, %v349_v53  ;;  %v548_v0 = vadd.f32 %v547_v60, %v485_v55  ;;  %v365_v53 = vld [vmem:[%s1647_s29 + $0x1f8] sm:$0xff]  ;;  %v501_v55 = vmul.f32 %v364_v49, %v364_v49 }
  0xa8   : > { %v502_v58 = vmul.f32 %v365_v53, %v365_v53 }
  0xa9   : > { %v414_v2 = vadd.f32 %v413_v62, %v350_v57  ;;  %v549_v4 = vadd.f32 %v548_v0, %v486_v59 }
  0xab   : > { %v415_v6 = vadd.f32 %v414_v2, %v351_v61  ;;  %v550_v8 = vadd.f32 %v549_v4, %v487_v63 }
  0xad   : > { %v416_v10 = vadd.f32 %v415_v6, %v352_v1  ;;  %v551_v12 = vadd.f32 %v550_v8, %v488_v3 }
  0xaf   : > { %v417_v14 = vadd.f32 %v416_v10, %v353_v5  ;;  %v552_v16 = vadd.f32 %v551_v12, %v489_v7  ;;  %v366_v7 = vld [vmem:[%s1657_s6] sm:$0x1] }
  0xb0   : > { %v438_v12 = vld [vmem:[%s1660_s20] sm:$0x1] }
  0xb1   : > { %v418_v18 = vadd.f32 %v417_v14, %v354_v9  ;;  %v553_v20 = vadd.f32 %v552_v16, %v490_v11 }
  0xb3   : > { %v419_v22 = vadd.f32 %v418_v18, %v355_v13  ;;  %v554_v24 = vadd.f32 %v553_v20, %v491_v15 }
  0xb5   : > { %v420_v26 = vadd.f32 %v419_v22, %v356_v17  ;;  %v555_v28 = vadd.f32 %v554_v24, %v492_v19 }
  0xb7   : > { %v421_v30 = vadd.f32 %v420_v26, %v357_v21  ;;  %v556_v32 = vadd.f32 %v555_v28, %v493_v23 }
  0xb9   : > { %v422_v34 = vadd.f32 %v421_v30, %v358_v25  ;;  %v557_v36 = vadd.f32 %v556_v32, %v494_v27 }
  0xbb   : > { %v423_v38 = vadd.f32 %v422_v34, %v359_v29  ;;  %v558_v40 = vadd.f32 %v557_v36, %v495_v31 }
  0xbd   : > { %v424_v42 = vadd.f32 %v423_v38, %v360_v33  ;;  %v559_v44 = vadd.f32 %v558_v40, %v496_v35 }
  0xbf   : > { %v425_v46 = vadd.f32 %v424_v42, %v361_v37  ;;  %v560_v48 = vadd.f32 %v559_v44, %v497_v39 }
  0xc1   : > { %v426_v50 = vadd.f32 %v425_v46, %v362_v41  ;;  %v561_v52 = vadd.f32 %v560_v48, %v498_v43 }
  0xc3   : > { %v427_v54 = vadd.f32 %v426_v50, %v363_v45  ;;  %v562_v56 = vadd.f32 %v561_v52, %v499_v47 }
  0xc5   : > { %v428_v57 = vadd.f32 %v427_v54, %v364_v49  ;;  %v563_v59 = vadd.f32 %v562_v56, %v500_v51 }
  0xc7   : > { %v429_v60 = vadd.f32 %v428_v57, %v365_v53  ;;  %v564_v61 = vadd.f32 %v563_v59, %v501_v55 }
  0xc9   : > { %v430_v62 = vrot.slane %v429_v60, 4  ;;  %v565_v63 = vadd.f32 %v564_v61, %v502_v58 }
  0xcb   : > { %v431_v0 = vadd.f32 %v430_v62, %v429_v60  ;;  %v566_v1 = vrot.slane %v565_v63, 4 }
  0xcd   : > { %v432_v2 = vrot.slane %v431_v0, 2  ;;  %v567_v3 = vadd.f32 %v566_v1, %v565_v63 }
  0xcf   : > { %v433_v4 = vadd.f32 %v432_v2, %v431_v0  ;;  %v568_v5 = vrot.slane %v567_v3, 2 }
  0xd1   : > { %v434_v6 = vrot.slane %v433_v4, 1  ;;  %v569_v8 = vadd.f32 %v568_v5, %v567_v3 }
  0xd3   : > { %v435_v9 = vadd.f32 %v434_v6, %v433_v4  ;;  %v570_v10 = vrot.slane %v569_v8, 1 }
  0xd5   : > { %v436_v11 = vadd.f32 %v435_v9, %v366_v7  ;;  %v571_v13 = vadd.f32 %v570_v10, %v569_v8  ;;  %577 = sbr.rel (%p1049_p7) target bundleno = 667 (0x29b), region = 52 }
  0xd7   : > { %437 = vst [vmem:[%s1657_s6] sm:$0x1] %v436_v11  ;;  %v572_v14 = vadd.f32 %v571_v13, %v438_v12 }
  0xd9   : > { %573 = vst [vmem:[%s1660_s20] sm:$0x1] %v572_v14 }
  0xda   : > { %v595_v15 = vld [vmem:[%s1931_s3 + $0x78] sm:$0xff]  ;;  %v1490_v16 = vmov 0.0   ;;  %v594_v17 = vld [vmem:[%s1931_s3 + $0x70] sm:$0xff]  ;;  %v593_v18 = vld [vmem:[%s1931_s3 + $0x68] sm:$0xff]  ;;  %vm1491_vm0 = vmmov 0   ;;  %vm746_vm1 = vcmask 261120  }
  0xdb   : > { %1100 = vmatprep.subr.mxu0 %v1490_v16  ;;  %1135 = vmatprep.subr.mxu1 %v1490_v16  ;;  %v592_v19 = vld [vmem:[%s1931_s3 + $0x60] sm:$0xff]  ;;  %v591_v20 = vld [vmem:[%s1931_s3 + $0x58] sm:$0xff]  ;;  %v590_v21 = vld [vmem:[%s1931_s3 + $0x50] sm:$0xff] }
  0xdc   : > { %1101 = vmatpush3.msra.mxu0 %v595_v15  ;;  %1136 = vmatpush3.msra.mxu1 %v595_v15  ;;  %v589_v22 = vld [vmem:[%s1931_s3 + $0x48] sm:$0xff]  ;;  %v588_v23 = vld [vmem:[%s1931_s3 + $0x40] sm:$0xff]  ;;  %v587_v24 = vld [vmem:[%s1931_s3 + $0x38] sm:$0xff] }
  0xdd   : > { %1102 = vmatprep.subr.mxu0 %v1490_v16  ;;  %1137 = vmatprep.subr.mxu1 %v1490_v16  ;;  %v586_v25 = vld [vmem:[%s1931_s3 + $0x30] sm:$0xff]  ;;  %v585_v26 = vld [vmem:[%s1931_s3 + $0x28] sm:$0xff]  ;;  %v584_v27 = vld [vmem:[%s1931_s3 + $0x20] sm:$0xff] }
  0xde   : > { %1103 = vmatpush3.msra.mxu0 %v594_v17  ;;  %1138 = vmatpush3.msra.mxu1 %v594_v17  ;;  %v583_v28 = vld [vmem:[%s1931_s3 + $0x18] sm:$0xff]  ;;  %v582_v29 = vld [vmem:[%s1931_s3 + $0x10] sm:$0xff]  ;;  %v581_v30 = vld [vmem:[%s1931_s3 + $0x8] sm:$0xff] }
  0xdf   : > { %1104 = vmatprep.subr.mxu0 %v1490_v16  ;;  %1139 = vmatprep.subr.mxu1 %v1490_v16  ;;  %v580_v31 = vld [vmem:[%s1931_s3] sm:$0xff]  ;;  %v599_v34 = vld [vmem:[%s1932_s4 + $0x18] sm:$0xff]  ;;  %v598_v35 = vld [vmem:[%s1932_s4 + $0x10] sm:$0xff] }
  0xe0   : > { %1105 = vmatpush3.msra.mxu0 %v593_v18  ;;  %1140 = vmatpush3.msra.mxu1 %v593_v18  ;;  %v578_v32 = vld [vmem:[%s1657_s6] sm:$0x1]  ;;  %v597_v36 = vld [vmem:[%s1932_s4 + $0x8] sm:$0xff] }
  0xe1   : > { %1106 = vmatprep.subr.mxu0 %v1490_v16  ;;  %1141 = vmatprep.subr.mxu1 %v1490_v16  ;;  %v579_v33 = vld [vmem:[%s1660_s20] sm:$0x1] }
  0xe2   : > { %1107 = vmatpush3.msra.mxu0 %v592_v19  ;;  %1142 = vmatpush3.msra.mxu1 %v592_v19  ;;  %v596_v37 = vld [vmem:[%s1932_s4] sm:$0xff] }
  0xe3   : > { %1108 = vmatprep.subr.mxu0 %v1490_v16  ;;  %1143 = vmatprep.subr.mxu1 %v1490_v16  ;;  %v893_v50 = vld [vmem:[%s1959_s1] sm:$0x1] }
  0xe4   : > { %1109 = vmatpush3.msra.mxu0 %v591_v20  ;;  %1144 = vmatpush3.msra.mxu1 %v591_v20  ;;  %v896_v53 = vld [vmem:[%s1930_s2] sm:$0x1] }
  0xe5   : > { %1110 = vmatprep.subr.mxu0 %v1490_v16  ;;  %1145 = vmatprep.subr.mxu1 %v1490_v16 }
  0xe6   : > { %1111 = vmatpush3.msra.mxu0 %v590_v21  ;;  %1146 = vmatpush3.msra.mxu1 %v590_v21 }
  0xe7   : > { %1112 = vmatprep.subr.mxu0 %v1490_v16  ;;  %1147 = vmatprep.subr.mxu1 %v1490_v16 }
  0xe8   : > { %1113 = vmatpush3.msra.mxu0 %v589_v22  ;;  %1148 = vmatpush3.msra.mxu1 %v589_v22 }
  0xe9   : > { %1114 = vmatprep.subr.mxu0 %v1490_v16  ;;  %1149 = vmatprep.subr.mxu1 %v1490_v16 }
  0xea   : > { %1115 = vmatpush3.msra.mxu0 %v588_v23  ;;  %1150 = vmatpush3.msra.mxu1 %v588_v23 }
  0xeb   : > { %1116 = vmatprep.subr.mxu0 %v1490_v16  ;;  %1151 = vmatprep.subr.mxu1 %v1490_v16 }
  0xec   : > { %1117 = vmatpush3.msra.mxu0 %v587_v24  ;;  %1152 = vmatpush3.msra.mxu1 %v587_v24 }
  0xed   : > { %1118 = vmatprep.subr.mxu0 %v1490_v16  ;;  %1153 = vmatprep.subr.mxu1 %v1490_v16 }
  0xee   : > { %1119 = vmatpush3.msra.mxu0 %v586_v25  ;;  %1154 = vmatpush3.msra.mxu1 %v586_v25 }
  0xef   : > { %1120 = vmatprep.subr.mxu0 %v1490_v16  ;;  %1155 = vmatprep.subr.mxu1 %v1490_v16 }
  0xf0   : > { %1121 = vmatpush3.msra.mxu0 %v585_v26  ;;  %1156 = vmatpush3.msra.mxu1 %v585_v26 }
  0xf1   : > { %1122 = vmatprep.subr.mxu0 %v1490_v16  ;;  %1157 = vmatprep.subr.mxu1 %v1490_v16 }
  0xf2   : > { %1123 = vmatpush3.msra.mxu0 %v584_v27  ;;  %1158 = vmatpush3.msra.mxu1 %v584_v27 }
  0xf3   : > { %1124 = vmatprep.subr.mxu0 %v1490_v16  ;;  %1159 = vmatprep.subr.mxu1 %v1490_v16 }
  0xf4   : > { %1125 = vmatpush3.msra.mxu0 %v583_v28  ;;  %1160 = vmatpush3.msra.mxu1 %v583_v28 }
  0xf5   : > { %1126 = vmatprep.subr.mxu0 %v1490_v16  ;;  %1161 = vmatprep.subr.mxu1 %v1490_v16 }
  0xf6   : > { %1127 = vmatpush3.msra.mxu0 %v582_v29  ;;  %1162 = vmatpush3.msra.mxu1 %v582_v29 }
  0xf7   : > { %1128 = vmatprep.subr.mxu0 %v1490_v16  ;;  %1163 = vmatprep.subr.mxu1 %v1490_v16 }
  0xf8   : > { %1129 = vmatpush3.msra.mxu0 %v581_v30  ;;  %1164 = vmatpush3.msra.mxu1 %v581_v30 }
  0xf9   : > { %1130 = vmatprep.subr.mxu0 %v1490_v16  ;;  %1165 = vmatprep.subr.mxu1 %v1490_v16 }
  0xfa   : > { %1131 = vmatpush3.msra.mxu0 %v580_v31  ;;  %1132 = vmatprep.mubr.msk.f32.mxu0 %vm1491_vm0, %v1490_v16 }
  0xfb   : > { %1166 = vmatpush3.msra.mxu1 %v580_v31  ;;  %1167 = vmatprep.mubr.msk.f32.mxu1 %vm1491_vm0, %v1490_v16 }
  0xfc   : > { %1133 = vmatmul.mubr.f32.vlgmr.msra.gmra.mxu0 %v578_v32  ;;  %1168 = vmatmul.mubr.f32.vlgmr.msra.gmra.mxu1 %v579_v33 }
  0xfd   : > { %1170 = vmatprep.subr.mxu0 %v1490_v16  ;;  %1178 = vmatprep.mubr.msk.f32.mxu0 %vm1491_vm0, %v1490_v16 }
  0xfe   : > { %1171 = vmatpush3.msra.mxu0 %v599_v34  ;;  %1181 = vmatprep.subr.mxu1 %v1490_v16 }
  0xff   : > { %1172 = vmatprep.subr.mxu0 %v1490_v16  ;;  %1182 = vmatpush3.msra.mxu1 %v599_v34 }
 0x100   : > { %1173 = vmatpush3.msra.mxu0 %v598_v35  ;;  %1183 = vmatprep.subr.mxu1 %v1490_v16 }
 0x101   : > { %1174 = vmatprep.subr.mxu0 %v1490_v16  ;;  %1184 = vmatpush3.msra.mxu1 %v598_v35 }
 0x102   : > { %1185 = vmatprep.subr.mxu1 %v1490_v16  ;;  %1189 = vmatprep.mubr.msk.f32.mxu1 %vm1491_vm0, %v1490_v16 }
 0x103   : > { %1175 = vmatpush3.msra.mxu0 %v597_v36  ;;  %1186 = vmatpush3.msra.mxu1 %v597_v36 }
 0x104   : > { %1176 = vmatprep.subr.mxu0 %v1490_v16  ;;  %1187 = vmatprep.subr.mxu1 %v1490_v16 }
 0x105   : > { %1177 = vmatpush3.msra.mxu0 %v596_v37  ;;  %1188 = vmatpush3.msra.mxu1 %v596_v37 }
 0x1bc   : > { %v666_v38 = vpop.f32.mrf.mxu0  ;;  %v737_v39 = vpop.f32.mrf.mxu1 }
 0x1bd   : > { %v670_v40 = vmul.f32 0.00024414063, %v666_v38  ;;  %v741_v41 = vmul.f32 0.00024414063, %v737_v39 }
 0x1be   : > { %v1134_v42 = vpop.f32.mrf.mxu0  ;;  %v1169_v43 = vpop.f32.mrf.mxu1 }
 0x1bf   : > { %v742_v44 = vmul.f32 %v670_v40, %v670_v40  ;;  %1179 = vmatmul.mubr.msk.f32.vlgmr.msra.gmra.mxu0 %vm746_vm1, %v670_v40 }
 0x1c1   : > { %v743_v45 = vsub.f32 %v741_v41, %v742_v44 }
 0x1c3   : > { %v744_v46 = vadd.f32 1e-06, %v743_v45 }
 0x1c5   : > { %1304 = vrsqrt.f32 %v744_v46 }
 0x1d2   : > { %v1305_v47 = vpop.eup %1304 }
 0x1d3   : > { %1190 = vmatmul.mubr.msk.f32.vlgmr.msra.gmra.mxu1 %vm746_vm1, %v1305_v47 }
 0x27f   : > { %v816_v48 = vpop.f32.mrf.mxu0 }
 0x281   : > { %v1180_v49 = vpop.f32.mrf.mxu0 }
 0x293   : > { %v889_v51 = vpop.f32.mrf.mxu1 }
 0x294   : > { %v894_v52 = vmul.f32 %v893_v50, %v889_v51 }
 0x295   : > { %v1191_v54 = vpop.f32.mrf.mxu1 }
 0x296   : > { %895 = vst [vmem:[%s1657_s6] sm:$0x1] %v894_v52  ;;  %v897_v55 = vmul.f32 %v894_v52, %v816_v48 }
 0x298   : > { %v898_v56 = vsub.f32 %v896_v53, %v897_v55 }
 0x29a   : > { %899 = vst [vmem:[%s1660_s20] sm:$0x1] %v898_v56 }
 0x29b PF: > { %s1942_s15 = sshll.u32 %s1472_s28, 4  ;;  %s1961_s13 = sld [smem:[#allocation19_spill]] }
 0x29c   : > { %s917_s14 = sshll.u32 %s1657_s6, 4  ;;  %s901_s19 = scalar_lea.sflag [#allocation4], %s1654_s9  ;;  %s918_s14 = int_to_ptr.vmem [resolvable:$true] %s917_s14 }
 0x29d   : > { %s1334_s8 = scalar_lea.vmem %s918_s14, 16  ;;  %s1492_s17 = smov [#allocation5]  }
 0x29e   : > { %p1335_p6 = scmp.ne.s32.totalorder %s918_s14, %s1334_s8  ;;  %s1338_s18 = sshll.u32 %s1492_s17, 4  ;;  %s1339_s18 = int_to_ptr.vmem [resolvable:$false] %s1338_s18 }
 0x29f   : > { %s1340_s29 = scalar_lea.vmem %s1339_s18, 32  ;;  %p1341_p3 = scmp.lt.s32.totalorder %s918_s14, %s1339_s18 }
 0x2a0   : > { %p1336_p8 = pnand %p1335_p6, %p1611_p12  ;;  %p1342_p10 = scmp.lt.s32.totalorder %s1340_s29, %s1334_s8 }
 0x2a1   : > { %s915_s5 = scalar_lea.hbm %s1961_s13, %s1942_s15 }
 0x2a2   : > { %p1337_p9 = pneg %p1336_p8  ;;  %p1343_p11 = por %p1342_p10, %p1341_p3 }
 0x2a4   : > { %p1344_p13 = pnand %p1343_p11, %p1337_p9 }
 0x2a6   : > { %1347 = shalt.err (!%p1344_p13)
}
 0x2a7   : > { %s1348_s16 = scalar_lea.hbm %s915_s5, 16  ;;  %s1352_s27 = scalar_lea.hbm %s1961_s13, 32 }
 0x2a8   : > { %p1349_p0 = scmp.ne.s32.totalorder %s915_s5, %s1348_s16  ;;  %p1353_p4 = scmp.lt.s32.totalorder %s915_s5, %s1961_s13 }
 0x2a9   : > { %p1354_p7 = scmp.lt.s32.totalorder %s1352_s27, %s1348_s16 }
 0x2aa   : > { %p1350_p1 = pnand %p1349_p0, %p1611_p12 }
 0x2ab   : > { %p1355_p6 = por %p1354_p7, %p1353_p4 }
 0x2ac   : > { %p1351_p5 = pneg %p1350_p1 }
 0x2ae   : > { %p1356_p8 = pnand %p1355_p6, %p1351_p5 }
 0x2b0   : > { %1359 = shalt.err (!%p1356_p8)
}
 0x2b1   : > { %1194 = dma.vmem_to_hbm [thread:$0]  (%p1611_p12), %s918_s14, 16, %s915_s5, %s901_s19  }
 0x2b2   : > { %s1962_s8 = sshll.u32 %s1472_s28, 4  ;;  %s1963_s29 = sld [smem:[#allocation20_spill]] }
 0x2b3   : > { %s930_s0 = sshll.u32 %s1660_s20, 4  ;;  %s905_s15 = scalar_lea.sflag [#allocation7], %s1654_s9  ;;  %s931_s0 = int_to_ptr.vmem [resolvable:$true] %s930_s0 }
 0x2b4   : > { %s1360_s11 = scalar_lea.vmem %s931_s0, 16  ;;  %s1493_s16 = smov [#allocation6]  }
 0x2b5   : > { %p1361_p9 = scmp.ne.s32.totalorder %s931_s0, %s1360_s11  ;;  %s1364_s27 = sshll.u32 %s1493_s16, 4  ;;  %s1365_s27 = int_to_ptr.vmem [resolvable:$false] %s1364_s27 }
 0x2b6   : > { %s1366_s1 = scalar_lea.vmem %s1365_s27, 32  ;;  %p1367_p11 = scmp.lt.s32.totalorder %s931_s0, %s1365_s27 }
 0x2b7   : > { %p1362_p3 = pnand %p1361_p9, %p1611_p12  ;;  %p1368_p13 = scmp.lt.s32.totalorder %s1366_s1, %s1360_s11 }
 0x2b8   : > { %s1964_s6 = smov %s1963_s29  ;;  %s928_s24 = scalar_lea.hbm %s1963_s29, %s1962_s8 }
 0x2b9   : > { %p1363_p10 = pneg %p1362_p3  ;;  %p1369_p0 = por %p1368_p13, %p1367_p11 }
 0x2bb   : > { %p1370_p1 = pnand %p1369_p0, %p1363_p10 }
 0x2bd   : > { %1373 = shalt.err (!%p1370_p1)
}
 0x2be   : > { %s1374_s28 = scalar_lea.hbm %s928_s24, 16  ;;  %s1378_s5 = scalar_lea.hbm %s1964_s6, 32 }
 0x2bf   : > { %p1375_p5 = scmp.ne.s32.totalorder %s928_s24, %s1374_s28  ;;  %p1379_p6 = scmp.lt.s32.totalorder %s928_s24, %s1964_s6 }
 0x2c0   : > { %p1380_p8 = scmp.lt.s32.totalorder %s1378_s5, %s1374_s28 }
 0x2c1   : > { %p1376_p4 = pnand %p1375_p5, %p1611_p12 }
 0x2c2   : > { %p1381_p9 = por %p1380_p8, %p1379_p6 }
 0x2c3   : > { %p1377_p7 = pneg %p1376_p4 }
 0x2c5   : > { %p1382_p3 = pnand %p1381_p9, %p1377_p7 }
 0x2c7   : > { %1385 = shalt.err (!%p1382_p3)
}
 0x2c8   : > { %1195 = dma.vmem_to_hbm [thread:$0]  (%p1611_p12), %s931_s0, 16, %s928_s24, %s905_s15  }
 0x2c9 PF: > { %p1210_p10 = scmp.ge.s32.totalorder %s1484_s7, 2  ;;  %s942_s1 = sand.u32 1, %s1444_s21  }
 0x2ca   : > { %s943_s8 = scalar_lea.sflag [#allocation4], %s942_s1 }
 0x2cb   : > { %p1203_p11 = pnand %p1210_p10, %p1624_p2 }
 0x2cd   : > { %p1204_p13 = pneg %p1203_p11 }
 0x2cf   : > { %1435 = dma.done.wait (%p1204_p13), %s943_s8, 16  }
 0x2d0   : > { %1437 = vsyncadd (%p1204_p13), %s943_s8, 4294967280  ;;  %s951_s17 = scalar_lea.sflag [#allocation7], %s942_s1 }
 0x2d1   : > { %1439 = dma.done.wait (%p1204_p13), %s951_s17, 16  }
 0x2d2   : > { %1441 = vsyncadd (%p1204_p13), %s951_s17, 4294967280  ;;  %s26_s7 = sadd.s32 1, %s1484_s7   ;;  %s1965_s0 = sld [smem:[#allocation15_spill]] }
 0x2d3   : > { %p23_p0 = scmp.ge.s32.totalorder %s26_s7, 6   ;;  %s1966_s12 = sld [smem:[#allocation16_spill]] }
 0x2d4   : > { %s1967_s27 = sld [smem:[#allocation11_spill]]  ;;  %s1970_s21 = smov %s1448_s22 }
 0x2d5   : > { %s1968_s29 = sld [smem:[#allocation12_spill]]  ;;  %s1971_s22 = smov %s1452_s23 }
 0x2d6   : > { %s1969_s10 = sld [smem:[#allocation13_spill]]  ;;  %s1973_s24 = smov %s1460_s25 }
 0x2d7   : > { %s1974_s25 = smov %s1464_s26  ;;  %s1976_s28 = smov %s1480_s30 }
 0x2d8   : > { %s1972_s23 = smov %s1965_s0  ;;  %25 = sbr.rel (!%p23_p0) target bundleno = 16 (0x10), region = 110 }
 0x2d9   : > { %s1975_s26 = smov %s1966_s12 }
 0x2dc   : > { %s1977_s30 = smov %s1969_s10 }
 0x2dd   :  { %955 = vsyncpa [#allocation3], 1 }
 0x2de   :  { %957 = vsyncpa [#allocation3 + $0x1], 1 }
 0x2df   :  { %958 = vsyncpa [#allocation4], 1 }
 0x2e0   :  { %960 = vsyncpa [#allocation4 + $0x1], 1 }
 0x2e1   :  { %961 = vsyncpa [#allocation7], 1 }
 0x2e2   :  { %963 = vsyncpa [#allocation7 + $0x1], 1 }

</bundles_post_ra>
